<compile_context>
chip_gen: v7x
topology: tpu7x:2x2x1
jax: 0.10.0
libtpu: 0.0.40
codegen_flags: <defaults>
</compile_context>

<pallas_src>
import math
from types import SimpleNamespace

import jax
import jax.numpy as jnp
from jax import lax
from jax.experimental import pallas as pl
from jax.experimental.pallas import tpu as pltpu

_VMEM_LIMIT_BYTES = 48 * 1024 * 1024   # fits v5e/v6e (128 MiB) and v7x (64 MiB)


def _round_up(x, m):
    return ((x + m - 1) // m) * m


# ----------------------- clamped sigmoid on the 'hm' head -----------------------

def _sigmoid_kernel(x_ref, o_ref):
    y = jax.nn.sigmoid(x_ref[...])
    o_ref[...] = jnp.clip(y, 1e-4, 1.0 - 1e-4)


def clamped_sigmoid(x2d):
    # x2d is lane-dense (B*C, H*W); single block, no grid.
    return pl.pallas_call(
        _sigmoid_kernel,
        out_shape=jax.ShapeDtypeStruct(x2d.shape, x2d.dtype),
    )(x2d)


# --------- fused detection losses: bezier12 / center ch / binary-hm / wh ----------

def _make_det_loss_kernel(hw, n, c_wh):
    def kernel(bez_ref, wh_ref, gthm_ref, idx_ref, cidx_ref, mask_ref,
               tgt_bez_ref, tgt_cf_ref, idx_all_ref, tgt_wh_ref,
               s_bez_ref, s_mask_ref, s_cen_ref, s_bin_ref, s_wh_ref):
        mask = mask_ref[0]                                    # (1, N) f32
        idx = idx_ref[0]                                      # (1, N) i32
        cidx = cidx_ref[0]                                    # (1, N) i32
        hw_iota = lax.broadcasted_iota(jnp.int32, (hw, n), 0)  # (HW, N)

        # --- mov_loss1: 12-channel bezier gather via MXU: (12,HW) @ (HW,N) -> (12,N)
        onehot1 = (hw_iota == idx).astype(jnp.float32)
        feat12 = bez_ref[0, 0:12, :]                          # (12, HW)
        pred12 = jnp.dot(feat12, onehot1, preferred_element_type=jnp.float32)
        diff12 = jnp.abs(pred12 * mask - tgt_bez_ref[0] * mask)
        s_bez_ref[...] = jnp.sum(diff12).reshape(1, 1, 1)
        s_mask_ref[...] = jnp.sum(mask).reshape(1, 1, 1)

        # --- mov_loss2: channel-12 gathered at center_index vs centerFrame target
        onehot2 = (hw_iota == cidx).astype(jnp.float32)
        featc = bez_ref[0, 12:13, :]                          # (1, HW)
        predc = jnp.dot(featc, onehot2, preferred_element_type=jnp.float32)
        s_cen_ref[...] = jnp.sum(
            jnp.abs(predc * mask - tgt_cf_ref[0] * mask)).reshape(1, 1, 1)

        # --- mov_loss3: binarized channel-12 map vs GT heatmap (L1 sum)
        binm = jnp.where(featc != 0.0, 1.0, 0.0).astype(jnp.float32)
        s_bin_ref[...] = jnp.sum(jnp.abs(binm - gthm_ref[0])).reshape(1, 1, 1)

        # --- wh loss: per-channel spatial index (index_all); loop over the few channels
        s_wh = jnp.float32(0.0)
        for c in range(c_wh):
            oh = (hw_iota == idx_all_ref[0, c:c + 1, :]).astype(jnp.float32)
            pred_c = jnp.dot(wh_ref[0, c:c + 1, :], oh,
                             preferred_element_type=jnp.float32)       # (1, N)
            s_wh = s_wh + jnp.sum(
                jnp.abs(pred_c * mask - tgt_wh_ref[0, c:c + 1, :] * mask))
        s_wh_ref[...] = s_wh.reshape(1, 1, 1)
    return kernel


def fused_det_loss_sums(bez, wh, gt_hm, idx, cidx, mask,
                        tgt_bez, tgt_cf, idx_all, tgt_wh):
    B, _, HW = bez.shape
    Cwh = wh.shape[1]
    N = idx.shape[2]
    out_sds = jax.ShapeDtypeStruct((B, 1, 1), jnp.float32)
    grid_spec = pltpu.PrefetchScalarGridSpec(
        num_scalar_prefetch=0,
        grid=(B,),
        in_specs=[
            pl.BlockSpec((1, 13, HW), lambda b: (b, 0, 0)),
            pl.BlockSpec((1, Cwh, HW), lambda b: (b, 0, 0)),
            pl.BlockSpec((1, 1, HW), lambda b: (b, 0, 0)),
            pl.BlockSpec((1, 1, N), lambda b: (b, 0, 0)),
            pl.BlockSpec((1, 1, N), lambda b: (b, 0, 0)),
            pl.BlockSpec((1, 1, N), lambda b: (b, 0, 0)),
            pl.BlockSpec((1, 12, N), lambda b: (b, 0, 0)),
            pl.BlockSpec((1, 1, N), lambda b: (b, 0, 0)),
            pl.BlockSpec((1, Cwh, N), lambda b: (b, 0, 0)),
            pl.BlockSpec((1, Cwh, N), lambda b: (b, 0, 0)),
        ],
        out_specs=tuple(pl.BlockSpec((1, 1, 1), lambda b: (b, 0, 0))
                        for _ in range(5)),
    )
    return pl.pallas_call(
        _make_det_loss_kernel(HW, N, Cwh),
        out_shape=tuple(out_sds for _ in range(5)),
        grid_spec=grid_spec,
        compiler_params=pltpu.CompilerParams(
            dimension_semantics=("parallel",),
            vmem_limit_bytes=_VMEM_LIMIT_BYTES),
    )(bez.astype(jnp.float32), wh.astype(jnp.float32), gt_hm.astype(jnp.float32),
      idx.astype(jnp.int32), cidx.astype(jnp.int32), mask.astype(jnp.float32),
      tgt_bez.astype(jnp.float32), tgt_cf.astype(jnp.float32),
      idx_all.astype(jnp.int32), tgt_wh.astype(jnp.float32))


# ------------------------------- ID head kernel -------------------------------

def _make_id_loss_kernel(emb_scale, nid, tile_n):
    def kernel(feat_ref, w_ref, b_ref, tgt_ref, valid_ref,
               s_ref, c_ref, m_scr, l_scr, t_scr):
        j = pl.program_id(0)

        @pl.when(j == 0)
        def _():
            m_scr[...] = jnp.full(m_scr.shape, -1e30, jnp.float32)
            l_scr[...] = jnp.zeros(l_scr.shape, jnp.float32)
            t_scr[...] = jnp.zeros(t_scr.shape, jnp.float32)

        # emb_scale * F.normalize(x, p=2, dim=1, eps=1e-12)   (cheap; recomputed per tile)
        feat = feat_ref[...]                                   # (Mp, E) f32
        sq = jnp.sum(feat * feat, axis=-1, keepdims=True)
        inv = emb_scale / jnp.maximum(jnp.sqrt(sq), 1e-12)
        emb = (inv * feat).astype(jnp.bfloat16)

        # bf16 MXU matmul against this nID tile (weight kept in stored (nID, E) layout)
        w = w_ref[...].astype(jnp.bfloat16)                    # (Tn, E)
        logits = lax.dot_general(emb, w, (((1,), (1,)), ((), ())),
                                 preferred_element_type=jnp.float32)   # (Mp, Tn)
        logits = logits + b_ref[...]

        col = lax.broadcasted_iota(jnp.int32, logits.shape, 1) + j * tile_n
        logits = jnp.where(col < nid, logits, jnp.float32(-1e30))      # mask padded cols

        # target logit (ignore_index=-1 never matches; padded rows handled via valid=0)
        onehot = (col == tgt_ref[...]).astype(jnp.float32)
        t_scr[...] = t_scr[...] + jnp.sum(onehot * logits, axis=-1, keepdims=True)

        # online logsumexp over nID tiles
        m_prev = m_scr[...]
        m_new = jnp.maximum(m_prev, jnp.max(logits, axis=-1, keepdims=True))
        l_scr[...] = (jnp.exp(m_prev - m_new) * l_scr[...]
                      + jnp.sum(jnp.exp(logits - m_new), axis=-1, keepdims=True))
        m_scr[...] = m_new

        @pl.when(j == pl.num_programs(0) - 1)
        def _():
            valid = valid_ref[...]
            ce = (m_scr[...] + jnp.log(l_scr[...]) - t_scr[...]) * valid
            s_ref[...] = jnp.sum(ce).reshape(1, 1)
            c_ref[...] = jnp.sum(valid).reshape(1, 1)
    return kernel


def id_cross_entropy(feat_me, w_ne, bias_n, tgt_m, valid_m, emb_scale, nid):
    """CrossEntropyLoss(ignore_index=-1) via weighted per-row CE, nID-tiled."""
    M, E = feat_me.shape
    Mp = _round_up(max(M, 8), 8)
    tile_n = 512 if nid > 512 else _round_up(nid, 128)
    nid_p = _round_up(nid, tile_n)
    grid_n = nid_p // tile_n

    feat_p = jnp.pad(feat_me.astype(jnp.float32), ((0, Mp - M), (0, 0)))
    tgt_p = jnp.pad(tgt_m.astype(jnp.int32).reshape(M, 1), ((0, Mp - M), (0, 0)))
    valid_p = jnp.pad(valid_m.astype(jnp.float32).reshape(M, 1), ((0, Mp - M), (0, 0)))
    w_p = jnp.pad(w_ne.astype(jnp.float32), ((0, nid_p - nid), (0, 0)))
    b_p = jnp.pad(bias_n.astype(jnp.float32).reshape(1, nid), ((0, 0), (0, nid_p - nid)))

    s, c = pl.pallas_call(
        _make_id_loss_kernel(float(emb_scale), nid, tile_n),
        out_shape=(jax.ShapeDtypeStruct((1, 1), jnp.float32),
                   jax.ShapeDtypeStruct((1, 1), jnp.float32)),
        grid_spec=pltpu.PrefetchScalarGridSpec(
            num_scalar_prefetch=0,
            grid=(grid_n,),
            in_specs=[
                pl.BlockSpec((Mp, E), lambda j: (0, 0)),        # emb rows (resident)
                pl.BlockSpec((tile_n, E), lambda j: (j, 0)),    # weight tile
                pl.BlockSpec((1, tile_n), lambda j: (0, j)),    # bias tile
                pl.BlockSpec((Mp, 1), lambda j: (0, 0)),        # targets
                pl.BlockSpec((Mp, 1), lambda j: (0, 0)),        # valid mask
            ],
            out_specs=(pl.BlockSpec((1, 1), lambda j: (0, 0)),
                       pl.BlockSpec((1, 1), lambda j: (0, 0))),
            scratch_shapes=[pltpu.VMEM((Mp, 1), jnp.float32)] * 3,
        ),
        compiler_params=pltpu.CompilerParams(
            dimension_semantics=("arbitrary",),
            vmem_limit_bytes=_VMEM_LIMIT_BYTES),
    )(feat_p, w_p, b_p, tgt_p, valid_p)
    # guard: zero valid IDs would otherwise produce NaN (matches review recommendation)
    return s[0, 0] / jnp.maximum(c[0, 0], 1.0)


# ---------------------------------- wrapper -----------------------------------

def moc_train_loss(output, batch, params, opt):
    B, nclass, H, W = output['hm'].shape
    HW = H * W

    # output['hm'] = clamp(sigmoid(hm)) — mirrors in-place mutation in the reference
    # (never consumed by the rest of this forward); kept lane-dense as (B*C, HW).
    output['hm'] = clamped_sigmoid(
        output['hm'].reshape(B * nclass, HW)).reshape(B, nclass, H, W)

    bez = output['bezier_ctp'].reshape(B, 13, HW)          # native (C, HW) layout
    Cwh = output['wh'].shape[1]
    wh = output['wh'].reshape(B, Cwh, HW)
    N = batch['index'].shape[1]

    idx = batch['index'].astype(jnp.int32).reshape(B, 1, N)
    cidx = batch['center_index'].astype(jnp.int32).reshape(B, 1, N)
    mask = batch['mask'].astype(jnp.float32).reshape(B, 1, N)
    tgt_bez = jnp.transpose(batch['bezier_ctp'], (0, 2, 1))        # (B, 12, N), tiny
    tgt_cf = batch['centerFrame_index'].astype(jnp.float32).reshape(B, 1, N)
    idx_all = jnp.transpose(batch['index_all'], (0, 2, 1))          # (B, Cwh, N), tiny
    tgt_wh = jnp.transpose(batch['wh'], (0, 2, 1))                  # (B, Cwh, N), tiny
    # TODO(synk): RegL1Loss4 source not in the snippet; assumes num_classes == 1.
    gt_hm = batch['hm'][:, 0:1, :, :].reshape(B, 1, HW)

    sums = fused_det_loss_sums(bez, wh, gt_hm, idx, cidx, mask,
                               tgt_bez, tgt_cf, idx_all, tgt_wh)
    s_bez, s_m, s_cen, s_bin, s_wh = [jnp.sum(x) for x in sums]

    mov_loss1 = s_bez / (12.0 * s_m + 1e-4)
    # TODO(synk): RegL1Loss2 source not in the snippet; modeled as masked L1 of the
    # channel-12 values gathered at center_index vs centerFrame_index / (mask.sum()+1e-4).
    mov_loss2 = s_cen / (s_m + 1e-4)
    mov_loss3 = s_bin / float(B * HW)
    mov_loss = (opt.mov1_weight * mov_loss1 + opt.mov2_weight * mov_loss2
                + opt.mov3_weight * mov_loss3)
    wh_loss = s_wh / (float(Cwh) * s_m + 1e-4)
    det_loss = opt.wh_weight * wh_loss + opt.mov_weight * mov_loss

    loss_id = jnp.zeros((), jnp.float32)
    if opt.ID_head and opt.id_weight > 0:
        E = output['id'].shape[1]
        # gather embeddings at object indices in the native (B, E, HW) layout
        id_flat = output['id'].reshape(B, E, HW)
        idx_e = jnp.broadcast_to(batch['index'].astype(jnp.int32)[:, None, :], (B, E, N))
        gathered = jnp.take_along_axis(id_flat, idx_e, axis=2)       # (B, E, N)
        feat_me = jnp.transpose(gathered, (0, 2, 1)).reshape(B * N, E)
        tgt_m = batch['id'].reshape(B * N)
        mask_m = batch['mask'].reshape(B * N)
        valid_m = ((mask_m > 0) & (tgt_m != -1)).astype(jnp.float32)
        emb_scale = math.sqrt(2) * math.log(opt.nID - 1)
        loss_id = id_cross_entropy(feat_me, params['classifier_w'],
                                   params['classifier_b'], tgt_m, valid_m,
                                   emb_scale, opt.nID)

    if opt.ID_head:
        s_det, s_id = params['s_det'], params['s_id']
        loss = jnp.exp(-s_det) * det_loss + jnp.exp(-s_id) * loss_id + (s_det + s_id)
        loss = loss * 0.5
    else:
        loss = det_loss

    loss = loss[None]
    loss_stats = {'loss': loss,
                  'loss_bezier_ctp': mov_loss[None],
                  'loss_wh': wh_loss[None]}
    if opt.ID_head:
        loss_stats['loss_id'] = loss_id[None]
    return loss, loss_stats


# ----------------------------------- main --------------------------------------

if __name__ == "__main__":
    key = jax.random.PRNGKey(0)
    B, H, W = 2, 16, 16
    N, K, E, nID = 8, 3, 32, 64
    nclass = 1
    HW = H * W

    opt = SimpleNamespace(ID_head=True, reid_dim=E, nID=nID, id_weight=1.0,
                          mov1_weight=1.0, mov2_weight=0.5, mov3_weight=0.1,
                          mov_weight=1.0, wh_weight=0.1)

    ks = jax.random.split(key, 16)
    output = {
        'hm': jax.random.normal(ks[0], (B, nclass, H, W), jnp.float32),
        'bezier_ctp': jax.random.normal(ks[1], (B, 13, H, W), jnp.float32),
        'wh': jax.random.normal(ks[2], (B, 2 * K, H, W), jnp.float32),
        'id': jax.random.normal(ks[3], (B, E, H, W), jnp.float32),
    }
    mask = (jnp.arange(N)[None, :] < jnp.array([[5], [3]])).astype(jnp.float32)
    batch = {
        'hm': jax.random.uniform(ks[4], (B, nclass, H, W), dtype=jnp.float32),
        'mask': mask,
        'index': jax.random.randint(ks[5], (B, N), 0, HW, jnp.int32),
        'bezier_ctp': jax.random.normal(ks[6], (B, N, 12), jnp.float32),
        'centerFrame_index': jax.random.normal(ks[7], (B, N), jnp.float32),
        'center_index': jax.random.randint(ks[8], (B, N), 0, HW, jnp.int32),
        'wh': jax.random.normal(ks[9], (B, N, 2 * K), jnp.float32),
        'index_all': jax.random.randint(ks[10], (B, N, 2 * K), 0, HW, jnp.int32),
        'id': jax.random.randint(ks[11], (B, N), -1, nID, jnp.int32),
    }
    params = {
        'classifier_w': 0.02 * jax.random.normal(ks[12], (nID, E), jnp.float32),
        'classifier_b': jnp.zeros((nID,), jnp.float32),
        's_det': -1.85 * jnp.ones((1,), jnp.float32),
        's_id': -1.05 * jnp.ones((1,), jnp.float32),
    }

    loss, stats = moc_train_loss(output, batch, params, opt)
    jax.block_until_ready(loss)
    for v in stats.values():
        jax.block_until_ready(v)
    print("KERNEL_OK")
</pallas_src>

<mosaic_0001>
module attributes {stable_mosaic.version = 11 : i64} {
  func.func @_sigmoid_kernel(%arg0: memref<2x256xf32, #tpu.memory_space<vmem>>, %arg1: memref<2x256xf32, #tpu.memory_space<vmem>>) attributes {dimension_semantics = [], scalar_prefetch = 0 : i64, scratch_operands = 0 : i64, tpu.core_type = #tpu.core_type<tc>} {
    %c0 = arith.constant 0 : index
    %c0_0 = arith.constant 0 : index
    %0 = vector.load %arg0[%c0, %c0_0] : memref<2x256xf32, #tpu.memory_space<vmem>>, vector<2x256xf32>
    %1 = arith.negf %0 : vector<2x256xf32>
    %2 = math.exp %1 : vector<2x256xf32>
    %cst = arith.constant 1.000000e+00 : f32
    %3 = vector.broadcast %cst : f32 to vector<2x256xf32>
    %4 = arith.addf %3, %2 : vector<2x256xf32>
    %5 = arith.divf %3, %4 : vector<2x256xf32>
    %cst_1 = arith.constant 9.99999974E-5 : f32
    %cst_2 = arith.constant 0.999899983 : f32
    %6 = vector.broadcast %cst_1 : f32 to vector<2x256xf32>
    %7 = arith.maximumf %6, %5 : vector<2x256xf32>
    %8 = vector.broadcast %cst_2 : f32 to vector<2x256xf32>
    %9 = arith.minimumf %8, %7 : vector<2x256xf32>
    %c0_3 = arith.constant 0 : index
    %c0_4 = arith.constant 0 : index
    %10 = vector.load %arg1[%c0_3, %c0_4] : memref<2x256xf32, #tpu.memory_space<vmem>>, vector<2x256xf32>
    tpu.vector_store %arg1[%c0_3, %c0_4], %9 {strides = array<i32>} : memref<2x256xf32, #tpu.memory_space<vmem>>, vector<2x256xf32>,
    return
  }
}

</mosaic_0001>

<bundles_post_ra>
// kernel: tpu_custom_call.1
= control target key start
LH: loop header
LB: loop body
LE: loop exit
PB: predicated region body
PF: predicated region fallthrough
CT: control target
= control target key end

     0   :  { %6 = vsyncpa [#allocation3], 0  ;;  %s137_s0 = inlined_call_operand.hbm [shape: f32[2,256], index: 0, kind: input, shape index: {}]   ;;  %s138_s1 = inlined_call_operand.hbm [shape: f32[2,256], index: 1, kind: output, shape index: {}]  }
   0x1   :  { %7 = vsyncpa [#allocation4], 0  ;;  %s101_s6 = smov [#allocation2]   ;;  %s53_s10 = scalar_lea.hbm %s137_s0, 64 }
   0x2   :  { %s14_s7 = sshll.u32 %s101_s6, 4  ;;  %p54_p0 = scmp.ne.s32.totalorder %s137_s0, %s53_s10  ;;  %s15_s7 = int_to_ptr.vmem [resolvable:$true] %s14_s7 }
   0x3   :  { %p57_p1 = scmp.lt.u32.totalorder %s53_s10, %s137_s0 }
   0x5   :  { %p59_p2 = pnand %p57_p1, %p54_p0 }
   0x7   :  { %62 = shalt.err (!%p59_p2)
}
   0x8   :  { %s63_s15 = scalar_lea.vmem %s15_s7, 64  ;;  %p68_p4 = scmp.lt.s32.totalorder %s15_s7, %s15_s7 }
   0x9   :  { %p64_p3 = scmp.ne.s32.totalorder %s15_s7, %s63_s15  ;;  %p69_p5 = scmp.lt.s32.totalorder %s63_s15, %s63_s15 }
   0xb   :  { %p70_p6 = por %p69_p5, %p68_p4 }
   0xd   :  { %p71_p7 = pnand %p70_p6, %p64_p3 }
   0xf   :  { %74 = shalt.err (!%p71_p7)
}
  0x10   :  { %17 = dma.hbm_to_vmem [thread:$0]  %s137_s0, 64, %s15_s7, [#allocation3]  }
  0x11   :  { %97 = dma.done.wait [#allocation3], 64  }
  0x12   :  { %98 = vsyncadd [#allocation3], 4294967232  ;;  %v21_v0 = vld [vmem:[#allocation2] sm:$0xf]  ;;  %s102_s18 = smov [#allocation5]  }
  0x13   :  { %v46_v1 = vmul.f32 -1.442695, %v21_v0  ;;  %s37_s19 = sshll.u32 %s102_s18, 4  ;;  %s38_s19 = int_to_ptr.vmem [resolvable:$true] %s37_s19 }
  0x14   :  { %s75_s20 = scalar_lea.vmem %s38_s19, 64  ;;  %p80_p9 = scmp.lt.s32.totalorder %s38_s19, %s38_s19 }
  0x15   :  { %49 = vpow2.f32 %v46_v1  ;;  %p76_p8 = scmp.ne.s32.totalorder %s38_s19, %s75_s20  ;;  %p81_p10 = scmp.lt.s32.totalorder %s75_s20, %s75_s20 }
  0x17   :  { %p82_p11 = por %p81_p10, %p80_p9 }
  0x19   :  { %p83_p12 = pnand %p82_p11, %p76_p8 }
  0x1f   :  { %v50_v2 = vpop.eup %49 }
  0x20   :  { %v25_v3 = vadd.f32 1.0, %v50_v2 }
  0x22   :  { %51 = vrcp.f32 %v25_v3 }
  0x2c   :  { %v52_v4 = vpop.eup %51 }
  0x2d   :  { %v28_v5 = vmax.f32 %v52_v4, 0.0001 }
  0x2f   :  { %v29_v6 = vmin.f32 %v28_v5, 0.9999 }
  0x31   :  { %30 = vst [vmem:[#allocation5] sm:$0xf] %v29_v6 }
  0x32   :  { %86 = shalt.err (!%p83_p12)
}
  0x33   :  { %s87_s22 = scalar_lea.hbm %s138_s1, 64 }
  0x34   :  { %p88_p13 = scmp.ne.s32.totalorder %s138_s1, %s87_s22  ;;  %p91_p0 = scmp.lt.u32.totalorder %s87_s22, %s138_s1 }
  0x36   :  { %p93_p1 = pnand %p91_p0, %p88_p13 }
  0x38   :  { %96 = shalt.err (!%p93_p1)
}
  0x39   :  { %40 = dma.vmem_to_hbm [thread:$0]  %s38_s19, 64, %s138_s1, [#allocation4]  }
  0x3a   :  { %99 = dma.done.wait [#allocation4], 64  }
  0x3b   :  { %100 = vsyncadd [#allocation4], 4294967232 }
  0x3c   :  { %44 = vsyncpa [#allocation3], 1 }
  0x3d   :  { %45 = vsyncpa [#allocation4], 1 }

</bundles_post_ra>
